<compile_context>
chip_gen: v6e
topology: v6e:2x2x1
jax: 0.10.0
libtpu: 0.0.40
codegen_flags: <defaults>
</compile_context>

<pallas_src>
import functools

import jax
import jax.numpy as jnp
from jax.experimental import pallas as pl
from jax.experimental.pallas import tpu as pltpu


def _round_up(x, m):
    return ((x + m - 1) // m) * m


def mlp_kernel(x_ref, w1_ref, b1_ref, w2_ref, b2_ref, o_ref):
    # fc1: bf16 MXU matmul, f32 accumulate: (tm, D_in) @ (D_in, H)
    h = jnp.dot(x_ref[...], w1_ref[...], preferred_element_type=jnp.float32)
    # bias + ReLU in f32 on the VPU
    h = jnp.maximum(h + b1_ref[...], 0.0)
    # fc2: cast activations back to bf16 for the MXU, accumulate f32
    out = jnp.dot(h.astype(w2_ref.dtype), w2_ref[...],
                  preferred_element_type=jnp.float32)
    o_ref[...] = (out + b2_ref[...]).astype(o_ref.dtype)


@functools.partial(jax.jit, static_argnames=("block_batch",))
def neural_net_forward(x, w1, b1, w2, b2, *, block_batch=128):
    """x: (B, input_size); w1: (input_size, hidden); b1: (hidden,);
    w2: (hidden, num_classes); b2: (num_classes,). Returns (B, num_classes)."""
    B, D_in = x.shape
    H = w1.shape[1]
    C = w2.shape[1]
    out_dtype = x.dtype

    # Lane-dense output: pad num_classes up to a multiple of 128.
    C_pad = _round_up(C, 128)
    # Batch tile: multiple of 8 sublanes, capped at block_batch MXU rows.
    tm = min(block_batch, _round_up(B, 8))
    B_pad = _round_up(B, tm)

    # bf16 MXU operands (accumulation stays f32 inside the kernel).
    x_p = jnp.zeros((B_pad, D_in), jnp.bfloat16).at[:B].set(x.astype(jnp.bfloat16))
    w1_b = w1.astype(jnp.bfloat16)
    w2_p = jnp.zeros((H, C_pad), jnp.bfloat16).at[:, :C].set(w2.astype(jnp.bfloat16))
    # Biases stay f32 for the VPU epilogue; b2 padded to the lane-dense width.
    b1_2d = b1.astype(jnp.float32).reshape(1, H)
    b2_2d = jnp.zeros((1, C_pad), jnp.float32).at[:, :C].set(b2.astype(jnp.float32))

    grid = (B_pad // tm,)

    out_padded = pl.pallas_call(
        mlp_kernel,
        out_shape=jax.ShapeDtypeStruct((B_pad, C_pad), out_dtype),
        grid=grid,
        in_specs=[
            pl.BlockSpec((tm, D_in), lambda i: (i, 0)),   # x: tiled over batch
            pl.BlockSpec((D_in, H), lambda i: (0, 0)),    # w1: resident in VMEM
            pl.BlockSpec((1, H), lambda i: (0, 0)),       # b1: resident
            pl.BlockSpec((H, C_pad), lambda i: (0, 0)),   # w2: resident
            pl.BlockSpec((1, C_pad), lambda i: (0, 0)),   # b2: resident
        ],
        out_specs=pl.BlockSpec((tm, C_pad), lambda i: (i, 0)),
        compiler_params=pltpu.CompilerParams(
            dimension_semantics=("parallel",),            # megacore-shardable
        ),
    )(x_p, w1_b, b1_2d, w2_p, b2_2d)

    # Strip batch / class padding.
    return out_padded[:B, :C]


def init_linear(key, in_features, out_features, dtype=jnp.float32):
    """Deterministic init mimicking torch.nn.Linear default
    (U[-1/sqrt(fan_in), 1/sqrt(fan_in)]). Weight returned as (in, out)."""
    kw, kb = jax.random.split(key)
    bound = 1.0 / (in_features ** 0.5)
    w = jax.random.uniform(kw, (in_features, out_features), dtype, -bound, bound)
    b = jax.random.uniform(kb, (out_features,), dtype, -bound, bound)
    return w, b


if __name__ == "__main__":
    # Shapes consistent with the module: input_size=32, hidden_size=64,
    # num_classes=16; batch=256 so the batch grid (tm=128 -> 2 steps) is used.
    batch, input_size, hidden_size, num_classes = 256, 32, 64, 16

    key = jax.random.PRNGKey(0)
    kx, k1, k2 = jax.random.split(key, 3)

    x = jax.random.normal(kx, (batch, input_size), jnp.float32)
    w1, b1 = init_linear(k1, input_size, hidden_size)
    w2, b2 = init_linear(k2, hidden_size, num_classes)

    out = neural_net_forward(x, w1, b1, w2, b2)
    out = jax.block_until_ready(out)
    assert out.shape == (batch, num_classes)

    # Reference with matched bf16 operand precision (f32 accumulation).
    xb = x.astype(jnp.bfloat16).astype(jnp.float32)
    w1b = w1.astype(jnp.bfloat16).astype(jnp.float32)
    w2b = w2.astype(jnp.bfloat16).astype(jnp.float32)
    ref_bf16 = jnp.maximum(xb @ w1b + b1, 0.0).astype(jnp.bfloat16).astype(jnp.float32) @ w2b + b2
    assert jnp.allclose(out, ref_bf16, atol=1e-3, rtol=1e-3), "mismatch vs bf16 reference"

    # Sanity check vs full-f32 reference (loose tolerance for bf16 operands).
    ref_f32 = jnp.maximum(x @ w1 + b1, 0.0) @ w2 + b2
    assert jnp.allclose(out, ref_f32, atol=5e-2, rtol=5e-2), "mismatch vs f32 reference"

    print("KERNEL_OK")
</pallas_src>

<mosaic_0001>
module attributes {stable_mosaic.version = 11 : i64} {
  func.func @mlp_kernel(%arg0: i32, %arg1: memref<128x32xbf16, #tpu.memory_space<vmem>>, %arg2: memref<32x64xbf16, #tpu.memory_space<vmem>>, %arg3: memref<1x64xf32, #tpu.memory_space<vmem>>, %arg4: memref<64x128xbf16, #tpu.memory_space<vmem>>, %arg5: memref<1x128xf32, #tpu.memory_space<vmem>>, %arg6: memref<128x128xf32, #tpu.memory_space<vmem>>) attributes {dimension_semantics = [#tpu.dimension_semantics<parallel>], iteration_bounds = array<i64: 2>, scalar_prefetch = 0 : i64, scratch_operands = 0 : i64, tpu.core_type = #tpu.core_type<tc>, window_params = [{transform_indices = @transform_0, window_bounds = array<i64: 128, 32>}, {pipeline_mode = #tpu.pipeline_mode<synchronous>, transform_indices = @transform_1, window_bounds = array<i64: 32, 64>}, {pipeline_mode = #tpu.pipeline_mode<synchronous>, transform_indices = @transform_2, window_bounds = array<i64: 1, 64>}, {pipeline_mode = #tpu.pipeline_mode<synchronous>, transform_indices = @transform_3, window_bounds = array<i64: 64, 128>}, {pipeline_mode = #tpu.pipeline_mode<synchronous>, transform_indices = @transform_4, window_bounds = array<i64: 1, 128>}, {transform_indices = @transform_5, window_bounds = array<i64: 128, 128>}]} {
    %c0 = arith.constant 0 : index
    %c0_0 = arith.constant 0 : index
    %0 = vector.load %arg1[%c0, %c0_0] : memref<128x32xbf16, #tpu.memory_space<vmem>>, vector<128x32xbf16>
    %c0_1 = arith.constant 0 : index
    %c0_2 = arith.constant 0 : index
    %1 = vector.load %arg2[%c0_1, %c0_2] : memref<32x64xbf16, #tpu.memory_space<vmem>>, vector<32x64xbf16>
    %cst = arith.constant dense<0.000000e+00> : vector<128x64xf32>
    %2 = tpu.matmul %0, %1, %cst {dimension_numbers = #tpu.dot_dimension_numbers<[1], [0], [0], [1], [0, 0, 1, 1], [], []>} : vector<128x32xbf16>, vector<32x64xbf16>, vector<128x64xf32> -> vector<128x64xf32>
    %c0_3 = arith.constant 0 : index
    %c0_4 = arith.constant 0 : index
    %3 = vector.load %arg3[%c0_3, %c0_4] : memref<1x64xf32, #tpu.memory_space<vmem>>, vector<1x64xf32>
    %4 = vector.broadcast %3 : vector<1x64xf32> to vector<128x64xf32>
    %5 = arith.addf %2, %4 : vector<128x64xf32>
    %cst_5 = arith.constant 0.000000e+00 : f32
    %6 = vector.broadcast %cst_5 : f32 to vector<128x64xf32>
    %7 = arith.maximumf %5, %6 : vector<128x64xf32>
    %8 = arith.truncf %7 : vector<128x64xf32> to vector<128x64xbf16>
    %c0_6 = arith.constant 0 : index
    %c0_7 = arith.constant 0 : index
    %9 = vector.load %arg4[%c0_6, %c0_7] : memref<64x128xbf16, #tpu.memory_space<vmem>>, vector<64x128xbf16>
    %cst_8 = arith.constant dense<0.000000e+00> : vector<128x128xf32>
    %10 = tpu.matmul %8, %9, %cst_8 {dimension_numbers = #tpu.dot_dimension_numbers<[1], [0], [0], [1], [0, 0, 1, 1], [], []>} : vector<128x64xbf16>, vector<64x128xbf16>, vector<128x128xf32> -> vector<128x128xf32>
    %c0_9 = arith.constant 0 : index
    %c0_10 = arith.constant 0 : index
    %11 = vector.load %arg5[%c0_9, %c0_10] : memref<1x128xf32, #tpu.memory_space<vmem>>, vector<1x128xf32>
    %12 = vector.broadcast %11 : vector<1x128xf32> to vector<128x128xf32>
    %13 = arith.addf %10, %12 : vector<128x128xf32>
    %c0_11 = arith.constant 0 : index
    %c0_12 = arith.constant 0 : index
    %14 = vector.load %arg6[%c0_11, %c0_12] : memref<128x128xf32, #tpu.memory_space<vmem>>, vector<128x128xf32>
    tpu.vector_store %arg6[%c0_11, %c0_12], %13 {strides = array<i32>} : memref<128x128xf32, #tpu.memory_space<vmem>>, vector<128x128xf32>,
    return
  }
  func.func @transform_0(%arg0: i32) -> (i32, i32) {
    %c0_i32 = arith.constant 0 : i32
    %c0_i32_0 = arith.constant 0 : i32
    return %arg0, %c0_i32 : i32, i32
  }
  func.func @transform_1(%arg0: i32) -> (i32, i32) {
    %c0_i32 = arith.constant 0 : i32
    %c0_i32_0 = arith.constant 0 : i32
    %c0_i32_1 = arith.constant 0 : i32
    return %c0_i32, %c0_i32_0 : i32, i32
  }
  func.func @transform_2(%arg0: i32) -> (i32, i32) {
    %c0_i32 = arith.constant 0 : i32
    %c0_i32_0 = arith.constant 0 : i32
    %c0_i32_1 = arith.constant 0 : i32
    return %c0_i32, %c0_i32_0 : i32, i32
  }
  func.func @transform_3(%arg0: i32) -> (i32, i32) {
    %c0_i32 = arith.constant 0 : i32
    %c0_i32_0 = arith.constant 0 : i32
    %c0_i32_1 = arith.constant 0 : i32
    return %c0_i32, %c0_i32_0 : i32, i32
  }
  func.func @transform_4(%arg0: i32) -> (i32, i32) {
    %c0_i32 = arith.constant 0 : i32
    %c0_i32_0 = arith.constant 0 : i32
    %c0_i32_1 = arith.constant 0 : i32
    return %c0_i32, %c0_i32_0 : i32, i32
  }
  func.func @transform_5(%arg0: i32) -> (i32, i32) {
    %c0_i32 = arith.constant 0 : i32
    %c0_i32_0 = arith.constant 0 : i32
    return %arg0, %c0_i32 : i32, i32
  }
}

</mosaic_0001>

<bundles_post_ra>
// kernel: neural_net_forward.1
= control target key start
LH: loop header
LB: loop body
LE: loop exit
PB: predicated region body
PF: predicated region fallthrough
CT: control target
= control target key end

     0   :  { %s856_s18 = smov 0   ;;  %s935_s0 = inlined_call_operand.vmem [shape: bf16[256,32], index: 0, kind: input, shape index: {}]   ;;  %s936_s1 = inlined_call_operand.vmem [shape: bf16[32,64], index: 1, kind: input, shape index: {}]   ;;  %s937_s2 = inlined_call_operand.vmem [shape: f32[1,64], index: 2, kind: input, shape index: {}]   ;;  %s938_s3 = inlined_call_operand.vmem [shape: bf16[64,128], index: 3, kind: input, shape index: {}]   ;;  %s939_s4 = inlined_call_operand.vmem [shape: f32[1,128], index: 4, kind: input, shape index: {}]   ;;  %s940_s5 = inlined_call_operand.vmem [shape: f32[256,128], index: 5, kind: output, shape index: {}]  }
   0x1 LB: > { %s687_s19 = sadd.s32 4294967295, %s824_s18   ;;  %p691_p0 = scmp.ge.s32.totalorder %s824_s18, 1  ;;  %s824_s18 = sphi %s856_s18, %s15_s18  }
   0x2   : > { %p188_p1 = scmp.lt.s32.totalorder %s824_s18, 3 }
   0x4   : > { %p189_p2 = pnand %p691_p0, %p188_p1 }
   0x5   : > { %s692_s22 = sshll.u32 (!%p189_p2), %s687_s19, 4 }
   0x6   : > { %192 = sbr.rel (%p189_p2) target bundleno = 452 (0x1c4), region = 40  ;;  %p217_p3 = scmp.lt.s32.totalorder (!%p189_p2), %s692_s22, 31 }
   0xb   : > { %v804_v0 = vld [vmem:[%s936_s1 + $0x8] sm:$0xff]   ;;  %v805_v1 = vld [vmem:[%s936_s1] sm:$0xff]   ;;  %v814_v2 = vld [vmem:[%s938_s3 + $0x18] sm:$0xff]   ;;  %s942_s22 = smov (!%p217_p3, %s692_s22), 31  ;;  %vm308_vm0 = vcmask 261120   ;;  %vm493_vm1 = vcmask 523264  }
   0xc   : > { %752 = vmatprep.subr.bf16.mxu0 %v804_v0  ;;  %772 = vmatprep.subr.bf16.mxu1 %v814_v2  ;;  %s693_s27 = sshll.u32 %s942_s22, 2  ;;  %v815_v11 = vld [vmem:[%s938_s3 + $0x10] sm:$0xff]   ;;  %v816_v12 = vld [vmem:[%s938_s3 + $0x8] sm:$0xff]   ;;  %v817_v13 = vld [vmem:[%s938_s3] sm:$0xff]   ;;  %s695_s14 = sshll.u32 %s942_s22, 3 }
   0xd   : > { %753 = vmatpush3.bf16.msra.mxu0 %v804_v0  ;;  %773 = vmatpush3.bf16.msra.mxu1 %v814_v2  ;;  %s220_s30 = scalar_lea.vmem %s935_s0, %s693_s27  ;;  %v696_v16 = vld [vmem:[%s937_s2] ss:$0 sm:$0xff]  ;;  %s914_s20 = scalar_lea.vmem %s940_s5, %s695_s14 }
   0xe   : > { %754 = vmatprep.subr.bf16.mxu0 %v805_v1  ;;  %v806_v3 = vld [vmem:[%s220_s30] sm:$0xff]   ;;  %v807_v4 = vld [vmem:[%s220_s30 + $0x8] sm:$0xff]   ;;  %v808_v5 = vld [vmem:[%s220_s30 + $0x10] sm:$0xff]   ;;  %774 = vmatprep.subr.bf16.mxu1 %v815_v11 }
   0xf   : > { %756 = vmatprep.mubr.msk.bf16.mxu0 %vm308_vm0, %v806_v3  ;;  %v809_v6 = vld [vmem:[%s220_s30 + $0x18] sm:$0xff]   ;;  %v810_v7 = vld [vmem:[%s220_s30 + $0x20] sm:$0xff]   ;;  %v811_v8 = vld [vmem:[%s220_s30 + $0x28] sm:$0xff]  }
  0x10   : > { %v812_v9 = vld [vmem:[%s220_s30 + $0x30] sm:$0xff]   ;;  %v813_v10 = vld [vmem:[%s220_s30 + $0x38] sm:$0xff]  }
  0x11   : > { %755 = vmatpush3.bf16.msra.mxu0 %v805_v1  ;;  %775 = vmatpush3.bf16.msra.mxu1 %v815_v11 }
  0x12   : > { %776 = vmatprep.subr.bf16.mxu1 %v816_v12 }
  0x14   : > { %757 = vmatmul.mubr.msk.bf16.vlgmr.msra.gmra.mxu0 %vm308_vm0, %v807_v4 }
  0x15   : > { %760 = vmatprep.mubr.msk.bf16.mxu0 %vm308_vm0, %v808_v5  ;;  %777 = vmatpush3.bf16.msra.mxu1 %v816_v12 }
  0x16   : > { %778 = vmatprep.subr.bf16.mxu1 %v817_v13 }
  0x19   : > { %779 = vmatpush3.bf16.msra.mxu1 %v817_v13 }
  0x1c   : > { %761 = vmatmul.mubr.msk.bf16.gmra.mxu0 %vm308_vm0, %v809_v6 }
  0x1d   : > { %764 = vmatprep.mubr.msk.bf16.mxu0 %vm308_vm0, %v810_v7  ;;  %v715_v7 = vld [vmem:[%s939_s4] ss:$0 sm:$0xff] }
  0x24   : > { %765 = vmatmul.mubr.msk.bf16.gmra.mxu0 %vm308_vm0, %v811_v8 }
  0x25   : > { %768 = vmatprep.mubr.msk.bf16.mxu0 %vm308_vm0, %v812_v9 }
  0x2c   : > { %769 = vmatmul.mubr.msk.bf16.gmra.mxu0 %vm308_vm0, %v813_v10 }
  0xd4   : > { %v758_v14 = vpop.f32.mrf.mxu0 }
  0xd5   : > { %v376_v20 = vadd.f32 %v758_v14, %v696_v16 }
  0xd6   : > { %v367_v15 = vpop.f32.mrf.mxu0 }
  0xd7   : > { %v368_v18 = vadd.f32 %v696_v16, %v367_v15  ;;  %v432_v27 = vmax.f32 %v376_v20, 0.0 }
  0xd8   : > { %v759_v17 = vpop.f32.mrf.mxu0 }
  0xd9   : > { %v379_v19 = vadd.f32 %v759_v17, %v696_v16  ;;  %v430_v25 = vmax.f32 %v368_v18, 0.0 }
  0xda   : > { %v370_v21 = vpop.f32.mrf.mxu0 }
  0xdb   : > { %v371_v22 = vadd.f32 %v696_v16, %v370_v21  ;;  %v433_v23 = vmax.f32 %v379_v19, 0.0 }
  0xdc   : > { %v762_v24 = vpop.f32.mrf.mxu0 }
  0xdd   : > { %v431_v26 = vmax.f32 %v371_v22, 0.0  ;;  %v447_v30 = vpack.c.bf16 %v433_v23, %v432_v27  ;;  %v392_v34 = vadd.f32 %v762_v24, %v696_v16 }
  0xde   : > { %v383_v28 = vpop.f32.mrf.mxu0 }
  0xdf   : > { %v446_v29 = vpack.c.bf16 %v431_v26, %v430_v25  ;;  %v384_v32 = vadd.f32 %v696_v16, %v383_v28  ;;  %v436_v41 = vmax.f32 %v392_v34, 0.0 }
  0xe0   : > { %v763_v31 = vpop.f32.mrf.mxu0 }
  0xe1   : > { %v395_v33 = vadd.f32 %v763_v31, %v696_v16  ;;  %780 = vmatprep.mubr.msk.bf16.mxu1 %vm493_vm1, %v446_v29  ;;  %v434_v39 = vmax.f32 %v384_v32, 0.0 }
  0xe2   : > { %v386_v35 = vpop.f32.mrf.mxu0  ;;  %781 = vmatmul.mubr.msk.bf16.vlgmr.msra.gmra.mxu1 %vm493_vm1, %v447_v30 }
  0xe3   : > { %v387_v36 = vadd.f32 %v696_v16, %v386_v35  ;;  %v437_v37 = vmax.f32 %v395_v33, 0.0 }
  0xe4   : > { %v766_v38 = vpop.f32.mrf.mxu0 }
  0xe5   : > { %v435_v40 = vmax.f32 %v387_v36, 0.0  ;;  %v449_v44 = vpack.c.bf16 %v437_v37, %v436_v41  ;;  %v408_v48 = vadd.f32 %v766_v38, %v696_v16 }
  0xe6   : > { %v399_v42 = vpop.f32.mrf.mxu0 }
  0xe7   : > { %v448_v43 = vpack.c.bf16 %v435_v40, %v434_v39  ;;  %v400_v46 = vadd.f32 %v696_v16, %v399_v42  ;;  %v440_v55 = vmax.f32 %v408_v48, 0.0 }
  0xe8   : > { %v767_v45 = vpop.f32.mrf.mxu0 }
  0xe9   : > { %v411_v47 = vadd.f32 %v767_v45, %v696_v16  ;;  %784 = vmatprep.mubr.msk.bf16.mxu1 %vm493_vm1, %v448_v43  ;;  %v438_v53 = vmax.f32 %v400_v46, 0.0 }
  0xea   : > { %v402_v49 = vpop.f32.mrf.mxu0  ;;  %785 = vmatmul.mubr.msk.bf16.gmra.mxu1 %vm493_vm1, %v449_v44 }
  0xeb   : > { %v403_v50 = vadd.f32 %v696_v16, %v402_v49  ;;  %v441_v51 = vmax.f32 %v411_v47, 0.0 }
  0xec   : > { %v770_v52 = vpop.f32.mrf.mxu0 }
  0xed   : > { %v439_v54 = vmax.f32 %v403_v50, 0.0  ;;  %v451_v58 = vpack.c.bf16 %v441_v51, %v440_v55  ;;  %v424_v62 = vadd.f32 %v770_v52, %v696_v16 }
  0xee   : > { %v415_v56 = vpop.f32.mrf.mxu0 }
  0xef   : > { %v450_v57 = vpack.c.bf16 %v439_v54, %v438_v53  ;;  %v416_v60 = vadd.f32 %v696_v16, %v415_v56  ;;  %v444_v4 = vmax.f32 %v424_v62, 0.0 }
  0xf0   : > { %v771_v59 = vpop.f32.mrf.mxu0 }
  0xf1   : > { %v427_v61 = vadd.f32 %v771_v59, %v696_v16  ;;  %788 = vmatprep.mubr.msk.bf16.mxu1 %vm493_vm1, %v450_v57  ;;  %v442_v2 = vmax.f32 %v416_v60, 0.0 }
  0xf2   : > { %v418_v63 = vpop.f32.mrf.mxu0  ;;  %789 = vmatmul.mubr.msk.bf16.gmra.mxu1 %vm493_vm1, %v451_v58 }
  0xf3   : > { %v419_v0 = vadd.f32 %v696_v16, %v418_v63  ;;  %v445_v1 = vmax.f32 %v427_v61, 0.0 }
  0xf5   : > { %v443_v3 = vmax.f32 %v419_v0, 0.0  ;;  %v453_v6 = vpack.c.bf16 %v445_v1, %v444_v4 }
  0xf7   : > { %v452_v5 = vpack.c.bf16 %v443_v3, %v442_v2 }
  0xf9   : > { %792 = vmatprep.mubr.msk.bf16.mxu1 %vm493_vm1, %v452_v5 }
  0xfa   : > { %793 = vmatmul.mubr.msk.bf16.gmra.mxu1 %vm493_vm1, %v453_v6 }
 0x1a2   : > { %v782_v8 = vpop.f32.mrf.mxu1 }
 0x1a3   : > { %v561_v9 = vadd.f32 %v782_v8, %v715_v7 }
 0x1a4   : > { %v552_v10 = vpop.f32.mrf.mxu1 }
 0x1a5   : > { %617 = vst [vmem:[%s914_s20 + $0x10] sm:$0xff] %v561_v9  ;;  %v553_v11 = vadd.f32 %v715_v7, %v552_v10 }
 0x1a6   : > { %v783_v12 = vpop.f32.mrf.mxu1 }
 0x1a7   : > { %615 = vst [vmem:[%s914_s20] sm:$0xff] %v553_v11  ;;  %v564_v13 = vadd.f32 %v783_v12, %v715_v7 }
 0x1a8   : > { %v555_v14 = vpop.f32.mrf.mxu1 }
 0x1a9   : > { %618 = vst [vmem:[%s914_s20 + $0x18] sm:$0xff] %v564_v13  ;;  %v556_v15 = vadd.f32 %v715_v7, %v555_v14 }
 0x1aa   : > { %v786_v16 = vpop.f32.mrf.mxu1 }
 0x1ab   : > { %616 = vst [vmem:[%s914_s20 + $0x8] sm:$0xff] %v556_v15  ;;  %v577_v17 = vadd.f32 %v786_v16, %v715_v7 }
 0x1ac   : > { %v568_v18 = vpop.f32.mrf.mxu1 }
 0x1ad   : > { %621 = vst [vmem:[%s914_s20 + $0x30] sm:$0xff] %v577_v17  ;;  %v569_v19 = vadd.f32 %v715_v7, %v568_v18 }
 0x1ae   : > { %v787_v20 = vpop.f32.mrf.mxu1 }
 0x1af   : > { %619 = vst [vmem:[%s914_s20 + $0x20] sm:$0xff] %v569_v19  ;;  %v580_v21 = vadd.f32 %v787_v20, %v715_v7 }
 0x1b0   : > { %v571_v22 = vpop.f32.mrf.mxu1 }
 0x1b1   : > { %622 = vst [vmem:[%s914_s20 + $0x38] sm:$0xff] %v580_v21  ;;  %v572_v23 = vadd.f32 %v715_v7, %v571_v22 }
 0x1b2   : > { %v790_v24 = vpop.f32.mrf.mxu1 }
 0x1b3   : > { %620 = vst [vmem:[%s914_s20 + $0x28] sm:$0xff] %v572_v23  ;;  %v593_v25 = vadd.f32 %v790_v24, %v715_v7 }
 0x1b4   : > { %v584_v26 = vpop.f32.mrf.mxu1 }
 0x1b5   : > { %625 = vst [vmem:[%s914_s20 + $0x50] sm:$0xff] %v593_v25  ;;  %v585_v27 = vadd.f32 %v715_v7, %v584_v26 }
 0x1b6   : > { %v791_v28 = vpop.f32.mrf.mxu1 }
 0x1b7   : > { %623 = vst [vmem:[%s914_s20 + $0x40] sm:$0xff] %v585_v27  ;;  %v596_v29 = vadd.f32 %v791_v28, %v715_v7 }
 0x1b8   : > { %v587_v30 = vpop.f32.mrf.mxu1 }
 0x1b9   : > { %626 = vst [vmem:[%s914_s20 + $0x58] sm:$0xff] %v596_v29  ;;  %v588_v31 = vadd.f32 %v715_v7, %v587_v30 }
 0x1ba   : > { %v794_v32 = vpop.f32.mrf.mxu1 }
 0x1bb   : > { %624 = vst [vmem:[%s914_s20 + $0x48] sm:$0xff] %v588_v31  ;;  %v609_v33 = vadd.f32 %v794_v32, %v715_v7 }
 0x1bc   : > { %v600_v34 = vpop.f32.mrf.mxu1 }
 0x1bd   : > { %629 = vst [vmem:[%s914_s20 + $0x70] sm:$0xff] %v609_v33  ;;  %v601_v35 = vadd.f32 %v715_v7, %v600_v34 }
 0x1be   : > { %v795_v36 = vpop.f32.mrf.mxu1 }
 0x1bf   : > { %627 = vst [vmem:[%s914_s20 + $0x60] sm:$0xff] %v601_v35  ;;  %v612_v37 = vadd.f32 %v795_v36, %v715_v7 }
 0x1c0   : > { %v603_v38 = vpop.f32.mrf.mxu1 }
 0x1c1   : > { %630 = vst [vmem:[%s914_s20 + $0x78] sm:$0xff] %v612_v37  ;;  %v604_v39 = vadd.f32 %v715_v7, %v603_v38 }
 0x1c3   : > { %628 = vst [vmem:[%s914_s20 + $0x68] sm:$0xff] %v604_v39 }
 0x1c4 PF: > { %s15_s18 = sadd.s32 1, %s824_s18  }
 0x1c5   : > { %p12_p4 = scmp.ge.s32.totalorder %s15_s18, 4  }
 0x1c7   :  { %14 = sbr.rel (!%p12_p4) target bundleno = 1 (0x1), region = 70 }

</bundles_post_ra>
